<compile_context>
chip_gen: v7x
topology: tpu7x:2x2x1
jax: 0.10.0
libtpu: 0.0.40
codegen_flags: <defaults>
</compile_context>

<pallas_src>
import functools

import jax
import jax.numpy as jnp
from jax.experimental import pallas as pl
from jax.experimental.pallas import tpu as pltpu

# Module hyper-parameters (WeightedHuberLoss.__init__ defaults).
WTP = 20.0
WFP = 13.0
WFN = 18.0
WTN = 5.0
TS = 0.005  # float-threshold branch
# TODO(synk): the Ts == 'scipy' branch runs scipy.signal.find_peaks on host; no Pallas equivalent.

LANES = 128
SUBLANES = 8
TILE = SUBLANES * LANES          # 1024 elements: minimal f32 (8,128) slab
CHUNK_ROWS = 2048                # in-kernel compute chunk: 2048x128 f32 = 1 MiB per temporary


def _device_config():
    """Per-generation tiling config (plain Python values -> jit static args)."""
    kind = ""
    try:
        kind = jax.devices()[0].device_kind.lower()
    except Exception:
        pass
    if ("v7" in kind) or ("7x" in kind):
        # 2 TensorCores, 64 MiB VMEM/TC: smaller blocks, split the p axis across cores.
        return dict(max_parts=2,
                    block_bytes=4 * 1024 * 1024,    # 4 MiB/input block -> 16 MiB double-buffered
                    core_parallel=True,
                    vmem_limit=48 * 1024 * 1024)
    # v5e / v6e: single TensorCore, 128 MiB VMEM: go big on the block.
    return dict(max_parts=1,
                block_bytes=8 * 1024 * 1024,        # 8 MiB/input block -> 32 MiB double-buffered
                core_parallel=False,
                vmem_limit=64 * 1024 * 1024)


def _whl_kernel(yp_ref, yt_ref, o_ref, *, n_valid, block_rows, chunk_rows,
                blocks_per_part):
    p = pl.program_id(0)
    i = pl.program_id(1)

    # Output block index depends only on p, so it stays resident across the
    # inner (reduction) axis -> accumulate directly into o_ref (no scratch).
    @pl.when(i == 0)
    def _():
        o_ref[...] = jnp.zeros_like(o_ref)

    blk = p * blocks_per_part + i                   # logical block index
    block_elems = block_rows * LANES                # static python int
    # int32 scalar arithmetic: fine for any realistic loss input (< 2**31 elements).
    block_start = blk * block_elems
    block_end = block_start + block_elems

    n_full = block_rows // chunk_rows               # static
    rem = block_rows - n_full * chunk_rows          # static, multiple of 8

    def partial_sum(row0, nrows, masked):
        # Cast in-kernel (inputs may be bf16); compute stays f32 on all generations.
        yp = yp_ref[pl.ds(row0, nrows), :].astype(jnp.float32)
        yt = yt_ref[pl.ds(row0, nrows), :].astype(jnp.float32)

        below_t = yt <= TS
        below_p = yp <= TS
        # Exactly one of {TN, FP, FN, TP} holds per element -> two-level select.
        w = jnp.where(below_t,
                      jnp.where(below_p, WTN, WFP),
                      jnp.where(below_p, WFN, WTP))

        d = yp - yt
        ad = jnp.abs(d)
        m = jnp.minimum(ad, 1.0)                    # branch-free Huber (delta = 1)
        contrib = w * (m * (ad - 0.5 * m))

        if masked:
            # Element-level validity mask: only emitted for the (at most one)
            # block that overhangs the valid data, so the common path pays
            # zero extra VALU ops.  Also makes the result independent of any
            # pad / out-of-bounds values.
            row = jax.lax.broadcasted_iota(jnp.int32, (nrows, LANES), 0)
            lane = jax.lax.broadcasted_iota(jnp.int32, (nrows, LANES), 1)
            elem = block_start + (row0 + row) * LANES + lane
            contrib = jnp.where(elem < n_valid, contrib, 0.0)

        # vreg-shaped partial sums: pure VPU adds (no per-chunk cross-lane
        # reduce, no loop-carried scalar dependency).
        return jnp.sum(contrib.reshape(nrows // SUBLANES, SUBLANES, LANES),
                       axis=0, keepdims=True)

    def accumulate(masked):
        if n_full > 0:
            @pl.loop(0, n_full)
            def _(c):
                row0 = pl.multiple_of(c * chunk_rows, chunk_rows)
                o_ref[...] += partial_sum(row0, chunk_rows, masked)
        if rem > 0:
            o_ref[...] += partial_sum(n_full * chunk_rows, rem, masked)

    # Fast path: block lies entirely inside the valid range -> no mask ops.
    @pl.when(block_end <= n_valid)
    def _():
        accumulate(masked=False)

    # Slow path: the single partially-valid block -> element mask.
    @pl.when(jnp.logical_and(block_start < n_valid, block_end > n_valid))
    def _():
        accumulate(masked=True)
    # Fully-invalid blocks (clamped duplicates past the end) contribute nothing
    # and skip compute entirely.


@functools.partial(
    jax.jit,
    static_argnames=("max_parts", "block_bytes", "core_parallel", "vmem_limit"))
def _weighted_huber_loss_impl(x, y, *, max_parts, block_bytes, core_parallel,
                              vmem_limit):
    y_pred = x.reshape(-1)
    y_true = y.reshape(-1)
    n = y_pred.shape[0]

    if n % TILE != 0:
        # TODO(synk): this pad copies both inputs (uncommon path, n % 1024 != 0);
        # the in-kernel element mask makes the result independent of pad values.
        pad = TILE - (n % TILE)
        y_pred = jnp.pad(y_pred, (0, pad))
        y_true = jnp.pad(y_true, (0, pad))

    rows = y_pred.shape[0] // LANES          # multiple of 8 by construction
    yp2 = y_pred.reshape(rows, LANES)        # free reshape of a contiguous array
    yt2 = y_true.reshape(rows, LANES)

    itemsize = max(jnp.dtype(x.dtype).itemsize, jnp.dtype(y.dtype).itemsize)
    block_rows = min(block_bytes // (LANES * itemsize), rows)   # multiple of 8 or full dim
    chunk_rows = min(CHUNK_ROWS, block_rows)

    total_blocks = -(-rows // block_rows)
    num_parts = max(1, min(max_parts, total_blocks))
    blocks_per_part = -(-total_blocks // num_parts)

    def idx_map(p, i):
        # Clamp so overhanging (p, i) cells still address an in-range block;
        # the kernel skips / masks their contribution.
        return (jnp.minimum(p * blocks_per_part + i, total_blocks - 1), 0)

    kernel = functools.partial(
        _whl_kernel, n_valid=n, block_rows=block_rows, chunk_rows=chunk_rows,
        blocks_per_part=blocks_per_part)

    if num_parts > 1:
        lead = pltpu.CORE_PARALLEL if core_parallel else pltpu.PARALLEL
    else:
        lead = pltpu.ARBITRARY
    dims = (lead, pltpu.ARBITRARY)

    partials = pl.pallas_call(
        kernel,
        out_shape=jax.ShapeDtypeStruct((num_parts, SUBLANES, LANES), jnp.float32),
        grid_spec=pltpu.PrefetchScalarGridSpec(
            num_scalar_prefetch=0,
            grid=(num_parts, blocks_per_part),
            in_specs=[
                pl.BlockSpec((block_rows, LANES), idx_map),
                pl.BlockSpec((block_rows, LANES), idx_map),
            ],
            out_specs=pl.BlockSpec((1, SUBLANES, LANES), lambda p, i: (p, 0, 0)),
        ),
        compiler_params=pltpu.CompilerParams(
            dimension_semantics=dims,
            vmem_limit_bytes=vmem_limit,
        ),
    )(yp2, yt2)

    total = jnp.sum(partials)                # single small cross-lane reduce, done in XLA
    return jnp.sqrt(total / jnp.float32(n))


def weighted_huber_loss(x, y):
    cfg = _device_config()
    try:
        return _weighted_huber_loss_impl(x, y, **cfg)
    except Exception:
        # Fallback if CORE_PARALLEL dimension semantics are rejected on this
        # chip / runtime: keep the same kernel with a plain "parallel" axis.
        if cfg["core_parallel"]:
            cfg = dict(cfg, core_parallel=False)
            return _weighted_huber_loss_impl(x, y, **cfg)
        raise


def _reference(x, y):
    yp = x.reshape(-1).astype(jnp.float32)
    yt = y.reshape(-1).astype(jnp.float32)
    bt = yt <= TS
    bp = yp <= TS
    w = jnp.where(bt, jnp.where(bp, WTN, WFP), jnp.where(bp, WFN, WTP))
    d = yp - yt
    ad = jnp.abs(d)
    huber = jnp.where(ad <= 1.0, 0.5 * d * d, ad - 0.5)
    return jnp.sqrt(jnp.mean(w * huber))


if __name__ == "__main__":
    key = jax.random.PRNGKey(0)
    kx, ky = jax.random.split(key)

    # Small image-like GAN output / target pair (n % 1024 == 0: pad-free fast path).
    x = jax.random.uniform(kx, (2, 4, 16, 16), dtype=jnp.float32)
    y = jax.random.uniform(ky, (2, 4, 16, 16), dtype=jnp.float32)
    out = jax.block_until_ready(weighted_huber_loss(x, y))
    ref = _reference(x, y)
    assert jnp.allclose(out, ref, rtol=1e-5, atol=1e-6), (out, ref)

    # Odd-sized input: exercises the padded / element-masked slow path.
    x2 = jax.random.uniform(kx, (3, 5, 7), dtype=jnp.float32)
    y2 = jax.random.uniform(ky, (3, 5, 7), dtype=jnp.float32)
    out2 = jax.block_until_ready(weighted_huber_loss(x2, y2))
    ref2 = _reference(x2, y2)
    assert jnp.allclose(out2, ref2, rtol=1e-5, atol=1e-6), (out2, ref2)

    # Medium input: exercises the in-kernel chunk loop plus the remainder chunk
    # (rows = 2400 -> one 2048-row chunk + one 352-row remainder).
    x3 = jax.random.uniform(kx, (2, 3, 200, 256), dtype=jnp.float32)
    y3 = jax.random.uniform(ky, (2, 3, 200, 256), dtype=jnp.float32)
    out3 = jax.block_until_ready(weighted_huber_loss(x3, y3))
    ref3 = _reference(x3, y3)
    assert jnp.allclose(out3, ref3, rtol=1e-5, atol=1e-6), (out3, ref3)

    print("KERNEL_OK")
</pallas_src>

<mosaic_0001>
module attributes {stable_mosaic.version = 11 : i64} {
  func.func @_whl_kernel(%arg0: i32, %arg1: i32, %arg2: memref<16x128xf32, #tpu.memory_space<vmem>>, %arg3: memref<16x128xf32, #tpu.memory_space<vmem>>, %arg4: memref<1x8x128xf32, #tpu.memory_space<vmem>>) attributes {dimension_semantics = [#tpu.dimension_semantics<arbitrary>, #tpu.dimension_semantics<arbitrary>], iteration_bounds = array<i64: 1, 1>, scalar_prefetch = 0 : i64, scratch_operands = 0 : i64, tpu.core_type = #tpu.core_type<tc>, window_params = [{transform_indices = @transform_0, window_bounds = array<i64: 16, 128>}, {transform_indices = @transform_1, window_bounds = array<i64: 16, 128>}, {transform_indices = @transform_2, window_bounds = array<i64: 1, 8, 128>}]} {
    %c0_i32 = arith.constant 0 : i32
    %0 = arith.cmpi eq, %arg1, %c0_i32 : i32
    %1 = arith.extui %0 : i1 to i32
    %c0_i32_0 = arith.constant 0 : i32
    %2 = arith.cmpi ne, %1, %c0_i32_0 : i32
    scf.if %2 {
      %cst = arith.constant 0.000000e+00 : f32
      %15 = vector.broadcast %cst : f32 to vector<1x8x128xf32>
      %c0 = arith.constant 0 : index
      %c0_7 = arith.constant 0 : index
      %c0_8 = arith.constant 0 : index
      %16 = vector.load %arg4[%c0, %c0_7, %c0_8] : memref<1x8x128xf32, #tpu.memory_space<vmem>>, vector<1x8x128xf32>
      tpu.vector_store %arg4[%c0, %c0_7, %c0_8], %15 {strides = array<i32>} : memref<1x8x128xf32, #tpu.memory_space<vmem>>, vector<1x8x128xf32>,
    } else {
    }
    %c1_i32 = arith.constant 1 : i32
    %3 = arith.muli %arg0, %c1_i32 : i32
    %4 = arith.addi %3, %arg1 : i32
    %c2048_i32 = arith.constant 2048 : i32
    %5 = arith.muli %4, %c2048_i32 : i32
    %c2048_i32_1 = arith.constant 2048 : i32
    %6 = arith.addi %5, %c2048_i32_1 : i32
    %c2048_i32_2 = arith.constant 2048 : i32
    %7 = arith.cmpi sle, %6, %c2048_i32_2 : i32
    %8 = arith.extui %7 : i1 to i32
    %c0_i32_3 = arith.constant 0 : i32
    %9 = arith.cmpi ne, %8, %c0_i32_3 : i32
    scf.if %9 {
      %c0_i32_7 = arith.constant 0 : i32
      %c1_i32_8 = arith.constant 1 : i32
      %15 = arith.muli %c0_i32_7, %c1_i32_8 : i32
      %c0_i32_9 = arith.constant 0 : i32
      %16 = arith.addi %c0_i32_9, %15 : i32
      %c16_i32 = arith.constant 16 : i32
      %17 = arith.muli %16, %c16_i32 : i32
      %18 = tpu.assume_multiple %17, 16 : i32
      %c0 = arith.constant 0 : index
      %c0_10 = arith.constant 0 : index
      %c0_11 = arith.constant 0 : index
      %19 = vector.load %arg4[%c0, %c0_10, %c0_11] : memref<1x8x128xf32, #tpu.memory_space<vmem>>, vector<1x8x128xf32>
      %20 = arith.index_cast %18 : i32 to index
      %c0_12 = arith.constant 0 : index
      %21 = vector.load %arg2[%20, %c0_12] : memref<16x128xf32, #tpu.memory_space<vmem>>, vector<16x128xf32>
      %22 = arith.index_cast %18 : i32 to index
      %c0_13 = arith.constant 0 : index
      %23 = vector.load %arg3[%22, %c0_13] : memref<16x128xf32, #tpu.memory_space<vmem>>, vector<16x128xf32>
      %cst = arith.constant 5.000000e-03 : f32
      %24 = vector.broadcast %cst : f32 to vector<16x128xf32>
      %25 = arith.cmpf ole, %23, %24 : vector<16x128xf32>
      %cst_14 = arith.constant 5.000000e-03 : f32
      %26 = vector.broadcast %cst_14 : f32 to vector<16x128xf32>
      %27 = arith.cmpf ole, %21, %26 : vector<16x128xf32>
      %cst_15 = arith.constant 5.000000e+00 : f32
      %cst_16 = arith.constant 1.300000e+01 : f32
      %28 = vector.broadcast %cst_15 : f32 to vector<16x128xf32>
      %29 = vector.broadcast %cst_16 : f32 to vector<16x128xf32>
      %30 = arith.select %27, %28, %29 : vector<16x128xi1>, vector<16x128xf32>
      %cst_17 = arith.constant 1.800000e+01 : f32
      %cst_18 = arith.constant 2.000000e+01 : f32
      %31 = vector.broadcast %cst_17 : f32 to vector<16x128xf32>
      %32 = vector.broadcast %cst_18 : f32 to vector<16x128xf32>
      %33 = arith.select %27, %31, %32 : vector<16x128xi1>, vector<16x128xf32>
      %34 = arith.select %25, %30, %33 : vector<16x128xi1>, vector<16x128xf32>
      %35 = arith.subf %21, %23 : vector<16x128xf32>
      %36 = math.absf %35 : vector<16x128xf32>
      %cst_19 = arith.constant 1.000000e+00 : f32
      %37 = vector.broadcast %cst_19 : f32 to vector<16x128xf32>
      %38 = arith.minimumf %36, %37 : vector<16x128xf32>
      %cst_20 = arith.constant 5.000000e-01 : f32
      %39 = vector.broadcast %cst_20 : f32 to vector<16x128xf32>
      %40 = arith.mulf %39, %38 : vector<16x128xf32>
      %41 = arith.subf %36, %40 : vector<16x128xf32>
      %42 = arith.mulf %38, %41 : vector<16x128xf32>
      %43 = arith.mulf %34, %42 : vector<16x128xf32>
      %44 = vector.shape_cast %43 : vector<16x128xf32> to vector<2x8x128xf32>
      %cst_21 = arith.constant dense<0.000000e+00> : vector<8x128xf32>
      %45 = vector.multi_reduction <add>, %44, %cst_21 [0] : vector<2x8x128xf32> to vector<8x128xf32>
      %46 = vector.shape_cast %45 : vector<8x128xf32> to vector<1x8x128xf32>
      %47 = arith.addf %19, %46 : vector<1x8x128xf32>
      %c0_22 = arith.constant 0 : index
      %c0_23 = arith.constant 0 : index
      %c0_24 = arith.constant 0 : index
      %48 = vector.load %arg4[%c0_22, %c0_23, %c0_24] : memref<1x8x128xf32, #tpu.memory_space<vmem>>, vector<1x8x128xf32>
      tpu.vector_store %arg4[%c0_22, %c0_23, %c0_24], %47 {strides = array<i32>} : memref<1x8x128xf32, #tpu.memory_space<vmem>>, vector<1x8x128xf32>,
      %c1_i32_25 = arith.constant 1 : i32
    } else {
    }
    %c2048_i32_4 = arith.constant 2048 : i32
    %10 = arith.cmpi slt, %5, %c2048_i32_4 : i32
    %c2048_i32_5 = arith.constant 2048 : i32
    %11 = arith.cmpi sgt, %6, %c2048_i32_5 : i32
    %12 = arith.andi %10, %11 : i1
    %13 = arith.extui %12 : i1 to i32
    %c0_i32_6 = arith.constant 0 : i32
    %14 = arith.cmpi ne, %13, %c0_i32_6 : i32
    scf.if %14 {
      %c0_i32_7 = arith.constant 0 : i32
      %c1_i32_8 = arith.constant 1 : i32
      %15 = arith.muli %c0_i32_7, %c1_i32_8 : i32
      %c0_i32_9 = arith.constant 0 : i32
      %16 = arith.addi %c0_i32_9, %15 : i32
      %c16_i32 = arith.constant 16 : i32
      %17 = arith.muli %16, %c16_i32 : i32
      %18 = tpu.assume_multiple %17, 16 : i32
      %c0 = arith.constant 0 : index
      %c0_10 = arith.constant 0 : index
      %c0_11 = arith.constant 0 : index
      %19 = vector.load %arg4[%c0, %c0_10, %c0_11] : memref<1x8x128xf32, #tpu.memory_space<vmem>>, vector<1x8x128xf32>
      %20 = arith.index_cast %18 : i32 to index
      %c0_12 = arith.constant 0 : index
      %21 = vector.load %arg2[%20, %c0_12] : memref<16x128xf32, #tpu.memory_space<vmem>>, vector<16x128xf32>
      %22 = arith.index_cast %18 : i32 to index
      %c0_13 = arith.constant 0 : index
      %23 = vector.load %arg3[%22, %c0_13] : memref<16x128xf32, #tpu.memory_space<vmem>>, vector<16x128xf32>
      %cst = arith.constant 5.000000e-03 : f32
      %24 = vector.broadcast %cst : f32 to vector<16x128xf32>
      %25 = arith.cmpf ole, %23, %24 : vector<16x128xf32>
      %cst_14 = arith.constant 5.000000e-03 : f32
      %26 = vector.broadcast %cst_14 : f32 to vector<16x128xf32>
      %27 = arith.cmpf ole, %21, %26 : vector<16x128xf32>
      %cst_15 = arith.constant 5.000000e+00 : f32
      %cst_16 = arith.constant 1.300000e+01 : f32
      %28 = vector.broadcast %cst_15 : f32 to vector<16x128xf32>
      %29 = vector.broadcast %cst_16 : f32 to vector<16x128xf32>
      %30 = arith.select %27, %28, %29 : vector<16x128xi1>, vector<16x128xf32>
      %cst_17 = arith.constant 1.800000e+01 : f32
      %cst_18 = arith.constant 2.000000e+01 : f32
      %31 = vector.broadcast %cst_17 : f32 to vector<16x128xf32>
      %32 = vector.broadcast %cst_18 : f32 to vector<16x128xf32>
      %33 = arith.select %27, %31, %32 : vector<16x128xi1>, vector<16x128xf32>
      %34 = arith.select %25, %30, %33 : vector<16x128xi1>, vector<16x128xf32>
      %35 = arith.subf %21, %23 : vector<16x128xf32>
      %36 = math.absf %35 : vector<16x128xf32>
      %cst_19 = arith.constant 1.000000e+00 : f32
      %37 = vector.broadcast %cst_19 : f32 to vector<16x128xf32>
      %38 = arith.minimumf %36, %37 : vector<16x128xf32>
      %cst_20 = arith.constant 5.000000e-01 : f32
      %39 = vector.broadcast %cst_20 : f32 to vector<16x128xf32>
      %40 = arith.mulf %39, %38 : vector<16x128xf32>
      %41 = arith.subf %36, %40 : vector<16x128xf32>
      %42 = arith.mulf %38, %41 : vector<16x128xf32>
      %43 = arith.mulf %34, %42 : vector<16x128xf32>
      %44 = tpu.iota {dimensions = array<i32: 0>} : vector<16x128xi32>
      %45 = tpu.iota {dimensions = array<i32: 1>} : vector<16x128xi32>
      %46 = vector.broadcast %18 : i32 to vector<16x128xi32>
      %47 = arith.addi %46, %44 : vector<16x128xi32>
      %c128_i32 = arith.constant 128 : i32
      %48 = vector.broadcast %c128_i32 : i32 to vector<16x128xi32>
      %49 = arith.muli %47, %48 : vector<16x128xi32>
      %50 = vector.broadcast %5 : i32 to vector<16x128xi32>
      %51 = arith.addi %50, %49 : vector<16x128xi32>
      %52 = arith.addi %51, %45 : vector<16x128xi32>
      %c2048_i32_21 = arith.constant 2048 : i32
      %53 = vector.broadcast %c2048_i32_21 : i32 to vector<16x128xi32>
      %54 = arith.cmpi slt, %52, %53 : vector<16x128xi32>
      %cst_22 = arith.constant 0.000000e+00 : f32
      %55 = vector.broadcast %cst_22 : f32 to vector<16x128xf32>
      %56 = arith.select %54, %43, %55 : vector<16x128xi1>, vector<16x128xf32>
      %57 = vector.shape_cast %56 : vector<16x128xf32> to vector<2x8x128xf32>
      %cst_23 = arith.constant dense<0.000000e+00> : vector<8x128xf32>
      %58 = vector.multi_reduction <add>, %57, %cst_23 [0] : vector<2x8x128xf32> to vector<8x128xf32>
      %59 = vector.shape_cast %58 : vector<8x128xf32> to vector<1x8x128xf32>
      %60 = arith.addf %19, %59 : vector<1x8x128xf32>
      %c0_24 = arith.constant 0 : index
      %c0_25 = arith.constant 0 : index
      %c0_26 = arith.constant 0 : index
      %61 = vector.load %arg4[%c0_24, %c0_25, %c0_26] : memref<1x8x128xf32, #tpu.memory_space<vmem>>, vector<1x8x128xf32>
      tpu.vector_store %arg4[%c0_24, %c0_25, %c0_26], %60 {strides = array<i32>} : memref<1x8x128xf32, #tpu.memory_space<vmem>>, vector<1x8x128xf32>,
      %c1_i32_27 = arith.constant 1 : i32
    } else {
    }
    return
  }
  func.func @transform_0(%arg0: i32, %arg1: i32) -> (i32, i32) {
    %c1_i32 = arith.constant 1 : i32
    %0 = arith.muli %arg0, %c1_i32 : i32
    %1 = arith.addi %0, %arg1 : i32
    %c0_i32 = arith.constant 0 : i32
    %2 = arith.minsi %1, %c0_i32 : i32
    %c0_i32_0 = arith.constant 0 : i32
    %c0_i32_1 = arith.constant 0 : i32
    return %2, %c0_i32_0 : i32, i32
  }
  func.func @transform_1(%arg0: i32, %arg1: i32) -> (i32, i32) {
    %c1_i32 = arith.constant 1 : i32
    %0 = arith.muli %arg0, %c1_i32 : i32
    %1 = arith.addi %0, %arg1 : i32
    %c0_i32 = arith.constant 0 : i32
    %2 = arith.minsi %1, %c0_i32 : i32
    %c0_i32_0 = arith.constant 0 : i32
    %c0_i32_1 = arith.constant 0 : i32
    return %2, %c0_i32_0 : i32, i32
  }
  func.func @transform_2(%arg0: i32, %arg1: i32) -> (i32, i32, i32) {
    %c0_i32 = arith.constant 0 : i32
    %c0_i32_0 = arith.constant 0 : i32
    %c0_i32_1 = arith.constant 0 : i32
    return %arg0, %c0_i32, %c0_i32_0 : i32, i32, i32
  }
}

</mosaic_0001>

<bundles_post_ra>
// kernel: _weighted_huber_loss_impl.1
= control target key start
LH: loop header
LB: loop body
LE: loop exit
PB: predicated region body
PF: predicated region fallthrough
CT: control target
= control target key end

     0   :  { %7 = vsyncpa [#allocation3], 0  ;;  %s319_s0 = inlined_call_operand.hbm [shape: f32[16,128], index: 0, kind: input, shape index: {}]   ;;  %s320_s1 = inlined_call_operand.hbm [shape: f32[16,128], index: 1, kind: input, shape index: {}]   ;;  %s321_s2 = inlined_call_operand.hbm [shape: f32[1,8,128], index: 2, kind: output, shape index: {}]  }
   0x1   :  { %8 = vsyncpa [#allocation6], 0 }
   0x2   :  { %9 = vsyncpa [#allocation4], 0  ;;  %s261_s9 = smov [#allocation2]   ;;  %s189_s13 = scalar_lea.hbm %s319_s0, 256 }
   0x3   :  { %s21_s10 = sshll.u32 %s261_s9, 4  ;;  %p190_p0 = scmp.ne.s32.totalorder %s319_s0, %s189_s13  ;;  %s22_s10 = int_to_ptr.vmem [resolvable:$true] %s21_s10 }
   0x4   :  { %p193_p1 = scmp.lt.u32.totalorder %s189_s13, %s319_s0 }
   0x6   :  { %p195_p2 = pnand %p193_p1, %p190_p0 }
   0x8   :  { %198 = shalt.err (!%p195_p2)
}
   0x9   :  { %s199_s18 = scalar_lea.vmem %s22_s10, 256  ;;  %p204_p4 = scmp.lt.s32.totalorder %s22_s10, %s22_s10 }
   0xa   :  { %p200_p3 = scmp.ne.s32.totalorder %s22_s10, %s199_s18  ;;  %p205_p5 = scmp.lt.s32.totalorder %s199_s18, %s199_s18 }
   0xc   :  { %p206_p6 = por %p205_p5, %p204_p4 }
   0xe   :  { %p207_p7 = pnand %p206_p6, %p200_p3 }
  0x10   :  { %210 = shalt.err (!%p207_p7)
}
  0x11   :  { %s262_s19 = smov 128   ;;  %s263_s20 = smov 8  }
  0x12   :  { %27 = dma.hbm_to_vmem [thread:$0]  %s319_s0, 256, %s22_s10, [#allocation3], %s262_s19, %s262_s19, %s263_s20  }
  0x13   :  { %s264_s23 = smov [#allocation5]   ;;  %s211_s27 = scalar_lea.hbm %s320_s1, 256 }
  0x14   :  { %s39_s24 = sshll.u32 %s264_s23, 4  ;;  %p212_p8 = scmp.ne.s32.totalorder %s320_s1, %s211_s27  ;;  %s40_s24 = int_to_ptr.vmem [resolvable:$true] %s39_s24 }
  0x15   :  { %p215_p9 = scmp.lt.u32.totalorder %s211_s27, %s320_s1 }
  0x17   :  { %p217_p10 = pnand %p215_p9, %p212_p8 }
  0x19   :  { %220 = shalt.err (!%p217_p10)
}
  0x1a   :  { %s221_s4 = scalar_lea.vmem %s40_s24, 256  ;;  %p226_p12 = scmp.lt.s32.totalorder %s40_s24, %s40_s24 }
  0x1b   :  { %p222_p11 = scmp.ne.s32.totalorder %s40_s24, %s221_s4  ;;  %p227_p13 = scmp.lt.s32.totalorder %s221_s4, %s221_s4 }
  0x1d   :  { %p228_p0 = por %p227_p13, %p226_p12 }
  0x1f   :  { %p229_p1 = pnand %p228_p0, %p222_p11 }
  0x21   :  { %232 = shalt.err (!%p229_p1)
}
  0x22   :  { %45 = dma.hbm_to_vmem [thread:$0]  %s320_s1, 256, %s40_s24, [#allocation6], %s262_s19, %s262_s19, %s263_s20  }
  0x23   :  { %255 = dma.done.wait [#allocation3], 256  }
  0x24   :  { %256 = vsyncadd [#allocation3], 4294967040 }
  0x25   :  { %257 = dma.done.wait [#allocation6], 256  }
  0x26   :  { %258 = vsyncadd [#allocation6], 4294967040  ;;  %v73_v0 = vld [vmem:[#allocation2] sm:$0xff]  ;;  %v74_v1 = vld [vmem:[#allocation2 + $0x8] sm:$0xff]  ;;  %v265_v10 = vmov 13.0   ;;  %v266_v12 = vmov 20.0  }
  0x27   :  { %v75_v2 = vld [vmem:[#allocation5] sm:$0xff]  ;;  %v76_v3 = vld [vmem:[#allocation5 + $0x8] sm:$0xff]  ;;  %vm79_vm0 = vcmp.le.f32.partialorder %v73_v0, 0.005  ;;  %vm80_vm1 = vcmp.le.f32.partialorder %v74_v1, 0.005 }
  0x28   :  { %v87_v4 = vsub.f32 %v73_v0, %v75_v2  ;;  %v88_v5 = vsub.f32 %v74_v1, %v76_v3  ;;  %vm77_vm2 = vcmp.le.f32.partialorder %v75_v2, 0.005  ;;  %v81_v11 = vsel %vm79_vm0, 5.0, %v265_v10  ;;  %s267_s1 = smov [#allocation7]  }
  0x29   :  { %v83_v13 = vsel %vm79_vm0, 18.0, %v266_v12  ;;  %vm78_vm3 = vcmp.le.f32.partialorder %v76_v3, 0.005  ;;  %v82_v15 = vsel %vm80_vm1, 5.0, %v265_v10  ;;  %v84_v16 = vsel %vm80_vm1, 18.0, %v266_v12  ;;  %s167_s6 = sshll.u32 %s267_s1, 4  ;;  %s168_s6 = int_to_ptr.vmem [resolvable:$true] %s167_s6 }
  0x2a   :  { %v89_v6 = vand.u32 2147483647, %v87_v4  ;;  %v90_v7 = vand.u32 2147483647, %v88_v5  ;;  %v85_v19 = vsel %vm77_vm2, %v81_v11, %v83_v13  ;;  %v86_v21 = vsel %vm78_vm3, %v82_v15, %v84_v16  ;;  %s233_s7 = scalar_lea.vmem %s168_s6, 128  ;;  %p238_p3 = scmp.lt.s32.totalorder %s168_s6, %s168_s6 }
  0x2b   :  { %p234_p2 = scmp.ne.s32.totalorder %s168_s6, %s233_s7  ;;  %p239_p4 = scmp.lt.s32.totalorder %s233_s7, %s233_s7 }
  0x2c   :  { %v91_v8 = vmin.f32 %v89_v6, 1.0  ;;  %v92_v9 = vmin.f32 %v90_v7, 1.0 }
  0x2d   :  { %p240_p5 = por %p239_p4, %p238_p3 }
  0x2e   :  { %v93_v14 = vmul.f32 0.5, %v91_v8  ;;  %v94_v17 = vmul.f32 0.5, %v92_v9 }
  0x2f   :  { %p241_p6 = pnand %p240_p5, %p234_p2 }
  0x30   :  { %v95_v18 = vsub.f32 %v89_v6, %v93_v14  ;;  %v96_v20 = vsub.f32 %v90_v7, %v94_v17 }
  0x32   :  { %v97_v22 = vmul.f32 %v95_v18, %v91_v8  ;;  %v98_v23 = vmul.f32 %v96_v20, %v92_v9 }
  0x34   :  { %v99_v24 = vmul.f32 %v97_v22, %v85_v19  ;;  %v100_v25 = vmul.f32 %v98_v23, %v86_v21 }
  0x36   :  { %v101_v26 = vadd.f32 %v100_v25, %v99_v24 }
  0x38   :  { %103 = vst [vmem:[#allocation7] sm:$0xff] %v101_v26 }
  0x39   :  { %244 = shalt.err (!%p241_p6)
}
  0x3a   :  { %s245_s10 = scalar_lea.hbm %s321_s2, 128 }
  0x3b   :  { %p246_p7 = scmp.ne.s32.totalorder %s321_s2, %s245_s10  ;;  %p249_p8 = scmp.lt.u32.totalorder %s245_s10, %s321_s2 }
  0x3d   :  { %p251_p9 = pnand %p249_p8, %p246_p7 }
  0x3f   :  { %254 = shalt.err (!%p251_p9)
}
  0x40   :  { %170 = dma.vmem_to_hbm [thread:$0]  %s168_s6, 128, %s321_s2, [#allocation4]  }
  0x41   :  { %259 = dma.done.wait [#allocation4], 128  }
  0x42   :  { %260 = vsyncadd [#allocation4], 4294967168 }
  0x43   :  { %174 = vsyncpa [#allocation3], 1 }
  0x44   :  { %175 = vsyncpa [#allocation6], 1 }
  0x45   :  { %176 = vsyncpa [#allocation4], 1 }

</bundles_post_ra>
